<compile_context>
chip_gen: v6e
topology: v6e:2x2x1
jax: 0.10.0
libtpu: 0.0.40
codegen_flags: <defaults>
</compile_context>

<pallas_src>
import math
import functools

import jax
import jax.numpy as jnp
import numpy as np
from jax import lax
from jax.experimental import pallas as pl
from jax.experimental.pallas import tpu as pltpu

VOCAB = 768      # decoder output size is hard-coded to 768 in the module
_LN_EPS = 1e-12  # nn.LayerNorm(eps=1e-12)


def mlm_head_kernel(x_ref, w1_ref, b1_ref, g_ref, beta_ref, wd_ref, bd_ref, o_ref,
                    *, approximate_gelu):
    # x_ref:    (TN, H)   tile of tokens (rows independent)
    # w1_ref:   (H, H)    dense weight, pre-transposed [in, out]  (matmul dtype)
    # b1_ref:   (1, H)    dense bias                               (f32)
    # g_ref:    (1, H)    LayerNorm gamma                          (f32)
    # beta_ref: (1, H)    LayerNorm beta                           (f32)
    # wd_ref:   (H, 768)  decoder weight, pre-transposed           (matmul dtype)
    # bd_ref:   (1, 768)  decoder (tied) bias                      (f32)
    # o_ref:    (TN, 768)
    mm_dtype = w1_ref.dtype

    # ---- dense + bias (MXU, f32 accumulation) ----
    x = x_ref[...].astype(mm_dtype)
    h = jnp.dot(x, w1_ref[...], preferred_element_type=jnp.float32) + b1_ref[...]

    # ---- GELU: exact erf by default (matches the PyTorch reference) ----
    if approximate_gelu:
        h = jax.nn.gelu(h, approximate=True)          # tanh -> EUP slot
    else:
        h = h * 0.5 * (1.0 + lax.erf(h * (1.0 / math.sqrt(2.0))))

    # ---- LayerNorm over last dim, one-pass stats in f32 ----
    inv_h = 1.0 / h.shape[-1]
    mean = jnp.sum(h, axis=-1, keepdims=True) * inv_h
    ex2 = jnp.sum(h * h, axis=-1, keepdims=True) * inv_h
    var = jnp.maximum(ex2 - mean * mean, 0.0)          # guard tiny negative roundoff
    h = (h - mean) * lax.rsqrt(var + _LN_EPS) * g_ref[...] + beta_ref[...]

    # ---- decoder + tied bias (MXU, f32 accumulation) ----
    y = jnp.dot(h.astype(mm_dtype), wd_ref[...],
                preferred_element_type=jnp.float32) + bd_ref[...]
    o_ref[...] = y.astype(o_ref.dtype)


def _choose_tile_n(n_rows):
    # Prefer large MXU-friendly row tiles, and prefer an even number of tiles
    # so the single "parallel" grid axis shards evenly across v7x's 2 TCs.
    fallback = None
    for t in (512, 256, 128):
        if n_rows >= 2 * t:
            if pl.cdiv(n_rows, t) % 2 == 0:
                return t
            if fallback is None:
                fallback = t
    if fallback is not None:
        return fallback
    # Small-N fallback: a single sublane-aligned tile covering all rows.
    return min(128, max(8, 8 * ((n_rows + 7) // 8)))


def _vmem_limit_bytes(tile_n, H, mm_itemsize):
    x_bytes = 2 * tile_n * H * 4                    # x tile, double-buffered (f32 in HBM)
    o_bytes = 2 * tile_n * VOCAB * 4                # output tile, double-buffered
    w_bytes = (H * H + H * VOCAB) * mm_itemsize     # resident weights, single-buffered
    tmp_bytes = 4 * tile_n * max(H, VOCAB) * 4      # h / LN / y f32 temporaries
    est = x_bytes + o_bytes + w_bytes + tmp_bytes + (4 << 20)
    # >= 32 MiB (v5e scoped default is only 16 MiB), <= 48 MiB (v7x: 64 MiB/TC).
    return int(min(max(est, 32 << 20), 48 << 20))


@functools.partial(jax.jit,
                   static_argnames=("tile_n", "matmul_dtype", "approximate_gelu"))
def visual_only_mlm_head(x, w1, b1, gamma, beta, wd, bd, *, tile_n=None,
                         matmul_dtype=jnp.bfloat16, approximate_gelu=False):
    """x: [B, S, H] -> [B, S, 768].

    Weights are expected pre-transposed as [in, out]:
      w1 = dense.weight.T (H, H), wd = decoder.weight.T (H, 768).
    """
    B, S, H = x.shape
    N = B * S
    if tile_n is None:
        tile_n = _choose_tile_n(N)
    n_tiles = pl.cdiv(N, tile_n)

    # MXU operands in matmul_dtype (bf16 by default); everything else stays f32.
    w1 = w1.astype(matmul_dtype)
    wd = wd.astype(matmul_dtype)
    b1 = b1.reshape(1, H).astype(jnp.float32)
    gamma = gamma.reshape(1, H).astype(jnp.float32)
    beta = beta.reshape(1, H).astype(jnp.float32)
    bd = bd.reshape(1, VOCAB).astype(jnp.float32)

    # Uneven grid: no jnp.pad / out[:N] HBM round-trips. The edge block's store
    # is masked by Pallas; all ops are row-wise independent.
    x2 = x.reshape(N, H)

    mm_itemsize = jnp.dtype(matmul_dtype).itemsize
    flops = 2 * N * H * (H + VOCAB)
    bytes_accessed = (4 * N * (H + VOCAB)
                      + mm_itemsize * (H * H + H * VOCAB)
                      + 4 * (3 * H + VOCAB))
    cost = pl.CostEstimate(flops=flops, transcendentals=N * H,
                           bytes_accessed=bytes_accessed)

    # Constant-index blocks: single buffer (no benefit from double-buffering).
    resident = dict(pipeline_mode=pl.Buffered(1))

    kernel = functools.partial(mlm_head_kernel, approximate_gelu=approximate_gelu)

    out = pl.pallas_call(
        kernel,
        out_shape=jax.ShapeDtypeStruct((N, VOCAB), x.dtype),
        grid_spec=pltpu.PrefetchScalarGridSpec(
            num_scalar_prefetch=0,
            grid=(n_tiles,),
            in_specs=[
                pl.BlockSpec((tile_n, H), lambda i: (i, 0)),             # x tile
                pl.BlockSpec((H, H), lambda i: (0, 0), **resident),      # dense W
                pl.BlockSpec((1, H), lambda i: (0, 0), **resident),      # dense b
                pl.BlockSpec((1, H), lambda i: (0, 0), **resident),      # LN gamma
                pl.BlockSpec((1, H), lambda i: (0, 0), **resident),      # LN beta
                pl.BlockSpec((H, VOCAB), lambda i: (0, 0), **resident),  # decoder W
                pl.BlockSpec((1, VOCAB), lambda i: (0, 0), **resident),  # decoder b
            ],
            out_specs=pl.BlockSpec((tile_n, VOCAB), lambda i: (i, 0)),
        ),
        compiler_params=pltpu.CompilerParams(
            dimension_semantics=("parallel",),
            vmem_limit_bytes=_vmem_limit_bytes(tile_n, H, mm_itemsize),
        ),
        cost_estimate=cost,
    )(x2, w1, b1, gamma, beta, wd, bd)

    return out.reshape(B, S, VOCAB)


def reference(x, w1, b1, gamma, beta, wd, bd):
    # Pure-JAX mirror of the PyTorch module (f32 throughout).
    h = jnp.einsum("bsh,hk->bsk", x, w1) + b1
    h = h * 0.5 * (1.0 + lax.erf(h / math.sqrt(2.0)))
    mean = jnp.mean(h, axis=-1, keepdims=True)
    var = jnp.mean((h - mean) ** 2, axis=-1, keepdims=True)
    h = (h - mean) / jnp.sqrt(var + _LN_EPS) * gamma + beta
    return jnp.einsum("bsh,hv->bsv", h, wd) + bd


if __name__ == "__main__":
    B, S, H = 2, 8, 32  # batch, seq, hidden_size (small test shapes)

    key = jax.random.PRNGKey(0)
    kx, kw1, kb1, kwd = jax.random.split(key, 4)

    x = jax.random.normal(kx, (B, S, H), dtype=jnp.float32)

    # Deterministic synthetic parameters (shapes per module __init__),
    # weights pre-transposed to [in, out].
    w1 = jax.random.normal(kw1, (H, H), dtype=jnp.float32) * (1.0 / math.sqrt(H))
    b1 = jax.random.normal(kb1, (1, H), dtype=jnp.float32) * 0.02
    gamma = jnp.ones((1, H), dtype=jnp.float32)    # LayerNorm defaults
    beta = jnp.zeros((1, H), dtype=jnp.float32)
    wd = jax.random.normal(kwd, (H, VOCAB), dtype=jnp.float32) * (1.0 / math.sqrt(H))
    bd = jnp.zeros((1, VOCAB), dtype=jnp.float32)  # tied decoder bias, init zeros

    ref = jax.block_until_ready(reference(x, w1, b1, gamma, beta, wd, bd))

    # Fast path: bf16 MXU operands, f32 accumulation / elementwise.
    out_bf16 = visual_only_mlm_head(x, w1, b1, gamma, beta, wd, bd)
    out_bf16 = jax.block_until_ready(out_bf16)
    np.testing.assert_allclose(np.asarray(out_bf16), np.asarray(ref),
                               rtol=5e-2, atol=5e-2)

    # Exact-semantics path: f32 operands, tight tolerance.
    out_f32 = visual_only_mlm_head(x, w1, b1, gamma, beta, wd, bd,
                                   matmul_dtype=jnp.float32)
    out_f32 = jax.block_until_ready(out_f32)
    np.testing.assert_allclose(np.asarray(out_f32), np.asarray(ref),
                               rtol=1e-5, atol=1e-5)

    print("KERNEL_OK")
</pallas_src>

<mosaic_0001>
module attributes {stable_mosaic.version = 11 : i64} {
  func.func @mlm_head_kernel(%arg0: i32, %arg1: memref<16x32xf32, #tpu.memory_space<vmem>>, %arg2: memref<32x32xbf16, #tpu.memory_space<vmem>>, %arg3: memref<1x32xf32, #tpu.memory_space<vmem>>, %arg4: memref<1x32xf32, #tpu.memory_space<vmem>>, %arg5: memref<1x32xf32, #tpu.memory_space<vmem>>, %arg6: memref<32x768xbf16, #tpu.memory_space<vmem>>, %arg7: memref<1x768xf32, #tpu.memory_space<vmem>>, %arg8: memref<16x768xf32, #tpu.memory_space<vmem>>) attributes {dimension_semantics = [#tpu.dimension_semantics<parallel>], iteration_bounds = array<i64: 1>, scalar_prefetch = 0 : i64, scratch_operands = 0 : i64, tpu.core_type = #tpu.core_type<tc>, window_params = [{transform_indices = @transform_0, window_bounds = array<i64: 16, 32>}, {pipeline_mode = #tpu.pipeline_mode<synchronous>, transform_indices = @transform_1, window_bounds = array<i64: 32, 32>}, {pipeline_mode = #tpu.pipeline_mode<synchronous>, transform_indices = @transform_2, window_bounds = array<i64: 1, 32>}, {pipeline_mode = #tpu.pipeline_mode<synchronous>, transform_indices = @transform_3, window_bounds = array<i64: 1, 32>}, {pipeline_mode = #tpu.pipeline_mode<synchronous>, transform_indices = @transform_4, window_bounds = array<i64: 1, 32>}, {pipeline_mode = #tpu.pipeline_mode<synchronous>, transform_indices = @transform_5, window_bounds = array<i64: 32, 768>}, {pipeline_mode = #tpu.pipeline_mode<synchronous>, transform_indices = @transform_6, window_bounds = array<i64: 1, 768>}, {transform_indices = @transform_7, window_bounds = array<i64: 16, 768>}]} {
    %c0 = arith.constant 0 : index
    %c0_0 = arith.constant 0 : index
    %0 = vector.load %arg1[%c0, %c0_0] : memref<16x32xf32, #tpu.memory_space<vmem>>, vector<16x32xf32>
    %1 = arith.truncf %0 : vector<16x32xf32> to vector<16x32xbf16>
    %c0_1 = arith.constant 0 : index
    %c0_2 = arith.constant 0 : index
    %2 = vector.load %arg2[%c0_1, %c0_2] : memref<32x32xbf16, #tpu.memory_space<vmem>>, vector<32x32xbf16>
    %cst = arith.constant dense<0.000000e+00> : vector<16x32xf32>
    %3 = tpu.matmul %1, %2, %cst {dimension_numbers = #tpu.dot_dimension_numbers<[1], [0], [0], [1], [0, 0, 1, 1], [], []>} : vector<16x32xbf16>, vector<32x32xbf16>, vector<16x32xf32> -> vector<16x32xf32>
    %c0_3 = arith.constant 0 : index
    %c0_4 = arith.constant 0 : index
    %4 = vector.load %arg3[%c0_3, %c0_4] : memref<1x32xf32, #tpu.memory_space<vmem>>, vector<1x32xf32>
    %5 = vector.broadcast %4 : vector<1x32xf32> to vector<16x32xf32>
    %6 = arith.addf %3, %5 : vector<16x32xf32>
    %cst_5 = arith.constant 5.000000e-01 : f32
    %7 = vector.broadcast %cst_5 : f32 to vector<16x32xf32>
    %8 = arith.mulf %6, %7 : vector<16x32xf32>
    %cst_6 = arith.constant 0.707106769 : f32
    %9 = vector.broadcast %cst_6 : f32 to vector<16x32xf32>
    %10 = arith.mulf %6, %9 : vector<16x32xf32>
    %11 = math.erf %10 : vector<16x32xf32>
    %cst_7 = arith.constant 1.000000e+00 : f32
    %12 = vector.broadcast %cst_7 : f32 to vector<16x32xf32>
    %13 = arith.addf %12, %11 : vector<16x32xf32>
    %14 = arith.mulf %8, %13 : vector<16x32xf32>
    %cst_8 = arith.constant dense<0.000000e+00> : vector<16xf32>
    %15 = vector.multi_reduction <add>, %14, %cst_8 [1] : vector<16x32xf32> to vector<16xf32>
    %16 = vector.shape_cast %15 : vector<16xf32> to vector<16x1xf32>
    %cst_9 = arith.constant 3.125000e-02 : f32
    %17 = vector.broadcast %cst_9 : f32 to vector<16x1xf32>
    %18 = arith.mulf %16, %17 : vector<16x1xf32>
    %19 = arith.mulf %14, %14 : vector<16x32xf32>
    %cst_10 = arith.constant dense<0.000000e+00> : vector<16xf32>
    %20 = vector.multi_reduction <add>, %19, %cst_10 [1] : vector<16x32xf32> to vector<16xf32>
    %21 = vector.shape_cast %20 : vector<16xf32> to vector<16x1xf32>
    %cst_11 = arith.constant 3.125000e-02 : f32
    %22 = vector.broadcast %cst_11 : f32 to vector<16x1xf32>
    %23 = arith.mulf %21, %22 : vector<16x1xf32>
    %24 = arith.mulf %18, %18 : vector<16x1xf32>
    %25 = arith.subf %23, %24 : vector<16x1xf32>
    %cst_12 = arith.constant 0.000000e+00 : f32
    %26 = vector.broadcast %cst_12 : f32 to vector<16x1xf32>
    %27 = arith.maximumf %25, %26 : vector<16x1xf32>
    %28 = vector.broadcast %18 : vector<16x1xf32> to vector<16x32xf32>
    %29 = arith.subf %14, %28 : vector<16x32xf32>
    %cst_13 = arith.constant 9.99999996E-13 : f32
    %30 = vector.broadcast %cst_13 : f32 to vector<16x1xf32>
    %31 = arith.addf %27, %30 : vector<16x1xf32>
    %32 = math.rsqrt %31 : vector<16x1xf32>
    %33 = vector.broadcast %32 : vector<16x1xf32> to vector<16x32xf32>
    %34 = arith.mulf %29, %33 : vector<16x32xf32>
    %c0_14 = arith.constant 0 : index
    %c0_15 = arith.constant 0 : index
    %35 = vector.load %arg4[%c0_14, %c0_15] : memref<1x32xf32, #tpu.memory_space<vmem>>, vector<1x32xf32>
    %36 = vector.broadcast %35 : vector<1x32xf32> to vector<16x32xf32>
    %37 = arith.mulf %34, %36 : vector<16x32xf32>
    %c0_16 = arith.constant 0 : index
    %c0_17 = arith.constant 0 : index
    %38 = vector.load %arg5[%c0_16, %c0_17] : memref<1x32xf32, #tpu.memory_space<vmem>>, vector<1x32xf32>
    %39 = vector.broadcast %38 : vector<1x32xf32> to vector<16x32xf32>
    %40 = arith.addf %37, %39 : vector<16x32xf32>
    %41 = arith.truncf %40 : vector<16x32xf32> to vector<16x32xbf16>
    %c0_18 = arith.constant 0 : index
    %c0_19 = arith.constant 0 : index
    %42 = vector.load %arg6[%c0_18, %c0_19] : memref<32x768xbf16, #tpu.memory_space<vmem>>, vector<32x768xbf16>
    %cst_20 = arith.constant dense<0.000000e+00> : vector<16x768xf32>
    %43 = tpu.matmul %41, %42, %cst_20 {dimension_numbers = #tpu.dot_dimension_numbers<[1], [0], [0], [1], [0, 0, 1, 1], [], []>} : vector<16x32xbf16>, vector<32x768xbf16>, vector<16x768xf32> -> vector<16x768xf32>
    %c0_21 = arith.constant 0 : index
    %c0_22 = arith.constant 0 : index
    %44 = vector.load %arg7[%c0_21, %c0_22] : memref<1x768xf32, #tpu.memory_space<vmem>>, vector<1x768xf32>
    %45 = vector.broadcast %44 : vector<1x768xf32> to vector<16x768xf32>
    %46 = arith.addf %43, %45 : vector<16x768xf32>
    %c0_23 = arith.constant 0 : index
    %c0_24 = arith.constant 0 : index
    %47 = vector.load %arg8[%c0_23, %c0_24] : memref<16x768xf32, #tpu.memory_space<vmem>>, vector<16x768xf32>
    tpu.vector_store %arg8[%c0_23, %c0_24], %46 {strides = array<i32>} : memref<16x768xf32, #tpu.memory_space<vmem>>, vector<16x768xf32>,
    return
  }
  func.func @transform_0(%arg0: i32) -> (i32, i32) {
    %c0_i32 = arith.constant 0 : i32
    %c0_i32_0 = arith.constant 0 : i32
    return %arg0, %c0_i32 : i32, i32
  }
  func.func @transform_1(%arg0: i32) -> (i32, i32) {
    %c0_i32 = arith.constant 0 : i32
    %c0_i32_0 = arith.constant 0 : i32
    %c0_i32_1 = arith.constant 0 : i32
    return %c0_i32, %c0_i32_0 : i32, i32
  }
  func.func @transform_2(%arg0: i32) -> (i32, i32) {
    %c0_i32 = arith.constant 0 : i32
    %c0_i32_0 = arith.constant 0 : i32
    %c0_i32_1 = arith.constant 0 : i32
    return %c0_i32, %c0_i32_0 : i32, i32
  }
  func.func @transform_3(%arg0: i32) -> (i32, i32) {
    %c0_i32 = arith.constant 0 : i32
    %c0_i32_0 = arith.constant 0 : i32
    %c0_i32_1 = arith.constant 0 : i32
    return %c0_i32, %c0_i32_0 : i32, i32
  }
  func.func @transform_4(%arg0: i32) -> (i32, i32) {
    %c0_i32 = arith.constant 0 : i32
    %c0_i32_0 = arith.constant 0 : i32
    %c0_i32_1 = arith.constant 0 : i32
    return %c0_i32, %c0_i32_0 : i32, i32
  }
  func.func @transform_5(%arg0: i32) -> (i32, i32) {
    %c0_i32 = arith.constant 0 : i32
    %c0_i32_0 = arith.constant 0 : i32
    %c0_i32_1 = arith.constant 0 : i32
    return %c0_i32, %c0_i32_0 : i32, i32
  }
  func.func @transform_6(%arg0: i32) -> (i32, i32) {
    %c0_i32 = arith.constant 0 : i32
    %c0_i32_0 = arith.constant 0 : i32
    %c0_i32_1 = arith.constant 0 : i32
    return %c0_i32, %c0_i32_0 : i32, i32
  }
  func.func @transform_7(%arg0: i32) -> (i32, i32) {
    %c0_i32 = arith.constant 0 : i32
    %c0_i32_0 = arith.constant 0 : i32
    return %arg0, %c0_i32 : i32, i32
  }
}

</mosaic_0001>

<bundles_post_ra>
// kernel: visual_only_mlm_head.1
= control target key start
LH: loop header
LB: loop body
LE: loop exit
PB: predicated region body
PF: predicated region fallthrough
CT: control target
= control target key end

     0   :  { %v512_v1 = vmov 0.0   ;;  %vm513_vm0 = vmmov 0   ;;  %vm54_vm1 = vcmask 261120   ;;  %s629_s0 = inlined_call_operand.vmem [shape: f32[16,32], index: 0, kind: input, shape index: {}]   ;;  %s630_s1 = inlined_call_operand.vmem [shape: bf16[32,32], index: 1, kind: input, shape index: {}]   ;;  %s631_s2 = inlined_call_operand.vmem [shape: f32[1,32], index: 2, kind: input, shape index: {}]   ;;  %s632_s3 = inlined_call_operand.vmem [shape: f32[1,32], index: 3, kind: input, shape index: {}]   ;;  %s633_s4 = inlined_call_operand.vmem [shape: f32[1,32], index: 4, kind: input, shape index: {}]   ;;  %s634_s5 = inlined_call_operand.vmem [shape: bf16[32,768], index: 5, kind: input, shape index: {}]   ;;  %s635_s6 = inlined_call_operand.vmem [shape: f32[1,768], index: 6, kind: input, shape index: {}]   ;;  %s636_s7 = inlined_call_operand.hbm [shape: f32[16,768], index: 7, kind: output, shape index: {}]  }
   0x1   :  { %v462_v0 = vld [vmem:[%s630_s1 + $0x8] sm:$0xff]   ;;  %448 = vmatprep.subr.bf16.mxu0 %v512_v1  ;;  %v463_v2 = vld [vmem:[%s630_s1] sm:$0xff]   ;;  %452 = vmatprep.mubr.msk.bf16.mxu0 %vm513_vm0, %v512_v1 }
   0x2   :  { %449 = vmatpush3.bf16.msra.mxu0 %v462_v0  ;;  %v28_v3 = vld [vmem:[%s629_s0] sm:$0xff]  ;;  %v29_v4 = vld [vmem:[%s629_s0 + $0x8] sm:$0xff] }
   0x3   :  { %450 = vmatprep.subr.bf16.mxu0 %v512_v1  ;;  %v30_v5 = vpack.c.bf16 %v29_v4, %v28_v3 }
   0x6   :  { %451 = vmatpush3.bf16.msra.mxu0 %v463_v2 }
   0x7   :  { %12 = vsyncpa [#allocation3], 0  ;;  %v424_v6 = vld [vmem:[%s631_s2] ss:$0 sm:$0xff]  ;;  %v464_v29 = vld [vmem:[%s634_s5 + $0x34] ss:$24 sps:$4 sm:$0xff]  }
   0x8   :  { %v466_v30 = vld [vmem:[%s634_s5 + $0x30] ss:$24 sps:$4 sm:$0xff]   ;;  %v469_v32 = vld [vmem:[%s634_s5 + $0x3c] ss:$24 sps:$4 sm:$0xff]   ;;  %279 = vmatprep.subr.bf16.mxu1 %v464_v29  ;;  %v475_v34 = vld [vmem:[%s634_s5 + $0xc] ss:$24 sps:$4 sm:$0xff]  }
   0x9   :  { %453 = vmatmul.mubr.msk.bf16.vlgmr.msra.gmra.mxu0 %vm54_vm1, %v30_v5  ;;  %v467_v31 = vld [vmem:[%s634_s5 + $0x38] ss:$24 sps:$4 sm:$0xff]   ;;  %v470_v33 = vld [vmem:[%s634_s5 + $0x4] ss:$24 sps:$4 sm:$0xff]   ;;  %280 = vmatpush1.bf16.msra.mxu1 %v466_v30  ;;  %v473_v36 = vld [vmem:[%s634_s5 + $0x8] ss:$24 sps:$4 sm:$0xff]  }
   0xa   :  { %322 = vmatprep.subr.bf16.mxu0 %v469_v32  ;;  %v472_v35 = vld [vmem:[%s634_s5] ss:$24 sps:$4 sm:$0xff]   ;;  %281 = vmatprep.subr.bf16.mxu1 %v470_v33  ;;  %v478_v37 = vld [vmem:[%s634_s5 + $0x44] ss:$24 sps:$4 sm:$0xff]   ;;  %v514_v38 = vmov 0  }
   0xb   :  { %323 = vmatpush1.bf16.msra.mxu0 %v467_v31  ;;  %299 = vmatprep.mubr.bf16.mxu1 %v514_v38  ;;  %v428_v58 = vld [vmem:[%s632_s3] ss:$0 sm:$0xff]  ;;  %v481_v5 = vld [vmem:[%s634_s5 + $0x14] ss:$24 sps:$4 sm:$0xff]  }
   0xc   :  { %324 = vmatprep.subr.bf16.mxu0 %v475_v34  ;;  %342 = vmatprep.mubr.bf16.mxu0 %v514_v38  ;;  %v429_v63 = vld [vmem:[%s633_s4] ss:$0 sm:$0xff] }
   0xd   :  { %282 = vmatpush1.bf16.msra.mxu1 %v472_v35  ;;  %v476_v3 = vld [vmem:[%s634_s5 + $0x40] ss:$24 sps:$4 sm:$0xff]  }
   0xe   :  { %365 = vmatprep.subr.bf16.mxu1 %v478_v37 }
   0xf   :  { %325 = vmatpush1.bf16.msra.mxu0 %v473_v36 }
  0xc9   :  { %v92_v7 = vpop.f32.mrf.mxu0 }
  0xca   :  { %v93_v8 = vadd.f32 %v424_v6, %v92_v7  ;;  %v174_v7 = vlaneseq }
  0xcb   :  { %v454_v9 = vpop.f32.mrf.mxu0 }
  0xcc   :  { %v101_v10 = vmul.f32 0.70710677, %v93_v8  ;;  %v99_v16 = vmul.f32 0.5, %v93_v8  ;;  %v175_v8 = vshrl.u32 %v174_v7, 7 }
  0xcd   :  { %v95_v11 = vpop.f32.mrf.mxu0 }
  0xce   :  { %482 = verf.f32 %v101_v10  ;;  %v96_v12 = vadd.f32 %v424_v6, %v95_v11  ;;  %v479_v6 = vld [vmem:[%s634_s5 + $0x10] ss:$24 sps:$4 sm:$0xff]   ;;  %v176_v9 = vsub.s32 0, %v175_v8  ;;  %v184_v10 = vsub.s32 2, %v175_v8  ;;  %v172_v11 = vld [vmem:[%s635_s6] sm:$0x3f] }
  0xcf   :  { %v455_v13 = vpop.f32.mrf.mxu0  ;;  %s515_s5 = smov [#allocation2]  }
  0xd0   :  { %v102_v14 = vmul.f32 0.70710677, %v96_v12  ;;  %v100_v20 = vmul.f32 0.5, %v96_v12  ;;  %v180_v12 = vsub.s32 1, %v175_v8  ;;  %v188_v13 = vsub.s32 3, %v175_v8  ;;  %s413_s6 = sshll.u32 %s515_s5, 4  ;;  %s414_s6 = int_to_ptr.vmem [resolvable:$true] %s413_s6 }
  0xd1   :  { %s490_s2 = scalar_lea.vmem %s414_s6, 1536  ;;  %p495_p1 = scmp.lt.s32.totalorder %s414_s6, %s414_s6 }
  0xd2   :  { %484 = verf.f32 %v102_v14  ;;  %v177_v14 = vrot.slane %v172_v11, %v176_v9  ;;  %p491_p0 = scmp.ne.s32.totalorder %s414_s6, %s490_s2  ;;  %p496_p2 = scmp.lt.s32.totalorder %s490_s2, %s490_s2 }
  0xd4   :  { %p497_p3 = por %p496_p2, %p495_p1 }
  0xd6   :  { %p498_p4 = pnand %p497_p3, %p491_p0 }
  0xdb   :  { %v483_v15 = vpop.eup %482 }
  0xdc   :  { %v105_v17 = vadd.f32 1.0, %v483_v15  ;;  %v185_v15 = vrot.slane %v172_v11, %v184_v10 }
  0xde   :  { %v107_v18 = vmul.f32 %v105_v17, %v99_v16  ;;  %v181_v16 = vrot.slane %v172_v11, %v180_v12  ;;  %v189_v17 = vrot.slane %v172_v11, %v188_v13 }
  0xdf   :  { %v485_v19 = vpop.eup %484 }
  0xe0   :  { %v106_v21 = vadd.f32 1.0, %v485_v19  ;;  %v109_v22 = vsel %vm54_vm1, %v107_v18, 0.0  ;;  %v117_v23 = vmul.f32 %v107_v18, %v107_v18 }
  0xe1   :  { %110 = vadd.xlane.f32.xlu0 %v109_v22  ;;  %v192_v22 = vsub.s32 4, %v175_v8 }
  0xe2   :  { %v108_v24 = vmul.f32 %v106_v21, %v100_v20  ;;  %v119_v25 = vsel %vm54_vm1, %v117_v23, 0.0 }
  0xe3   :  { %120 = vadd.xlane.f32.xlu1 %v119_v25  ;;  %v193_v32 = vrot.slane %v172_v11, %v192_v22 }
  0xe4   :  { %v112_v26 = vsel %vm54_vm1, %v108_v24, 0.0  ;;  %v118_v27 = vmul.f32 %v108_v24, %v108_v24 }
  0xe5   :  { %113 = vadd.xlane.f32.xlu0 %v112_v26 }
  0xe6   :  { %v122_v28 = vsel %vm54_vm1, %v118_v27, 0.0  ;;  %v196_v27 = vsub.s32 5, %v175_v8 }
  0xe7   :  { %123 = vadd.xlane.f32.xlu1 %v122_v28 }
  0xe8   :  { %v197_v37 = vrot.slane %v172_v11, %v196_v27 }
 0x16a   :  { %v111_v39 = vpop.xlane.xlu0 %110 }
 0x16b   :  { %v115_v40 = vmul.f32 0.03125, %v111_v39 }
 0x16c   :  { %v121_v41 = vpop.xlane.xlu1 %120 }
 0x16d   :  { %v127_v42 = vmul.f32 %v115_v40, %v115_v40  ;;  %v125_v43 = vmul.f32 0.03125, %v121_v41  ;;  %v133_v55 = vsub.f32 %v107_v18, %v115_v40 }
 0x16e   :  { %v114_v44 = vpop.xlane.xlu0 %113 }
 0x16f   :  { %v129_v45 = vsub.f32 %v125_v43, %v127_v42  ;;  %v116_v46 = vmul.f32 0.03125, %v114_v44 }
 0x170   :  { %v124_v47 = vpop.xlane.xlu1 %123 }
 0x171   :  { %v131_v48 = vmax.f32 %v129_v45, 0.0  ;;  %v128_v49 = vmul.f32 %v116_v46, %v116_v46  ;;  %v126_v50 = vmul.f32 0.03125, %v124_v47  ;;  %v134_v59 = vsub.f32 %v108_v24, %v116_v46 }
 0x173   :  { %v135_v51 = vadd.f32 1e-12, %v131_v48  ;;  %v130_v52 = vsub.f32 %v126_v50, %v128_v49 }
 0x175   :  { %486 = vrsqrt.f32 %v135_v51  ;;  %v132_v53 = vmax.f32 %v130_v52, 0.0 }
 0x177   :  { %v136_v54 = vadd.f32 1e-12, %v132_v53 }
 0x179   :  { %488 = vrsqrt.f32 %v136_v54 }
 0x182   :  { %v487_v56 = vpop.eup %486 }
 0x183   :  { %v139_v57 = vmul.f32 %v487_v56, %v133_v55 }
 0x185   :  { %v148_v62 = vmul.f32 %v428_v58, %v139_v57 }
 0x186   :  { %v489_v60 = vpop.eup %488 }
 0x187   :  { %v140_v61 = vmul.f32 %v489_v60, %v134_v59  ;;  %v157_v1 = vadd.f32 %v429_v63, %v148_v62 }
 0x189   :  { %v149_v0 = vmul.f32 %v428_v58, %v140_v61 }
 0x18b   :  { %v158_v2 = vadd.f32 %v429_v63, %v149_v0 }
 0x18d   :  { %v159_v4 = vpack.c.bf16 %v158_v2, %v157_v1 }
 0x18f   :  { %442 = vmatmul.mubr.msk.bf16.vlgmr.msra.gmra.mxu1 %vm54_vm1, %v159_v4  ;;  %443 = vmatmul.mubr.msk.bf16.vlgmr.msra.gmra.mxu0 %vm54_vm1, %v159_v4 }
 0x190   :  { %366 = vmatpush1.bf16.msra.mxu1 %v476_v3  ;;  %385 = vmatprep.mubr.bf16.mxu1 %v514_v38 }
 0x191   :  { %367 = vmatprep.subr.bf16.mxu1 %v481_v5 }
 0x194   :  { %368 = vmatpush1.bf16.msra.mxu1 %v479_v6 }
 0x197   :  { %444 = vmatmul.mubr.msk.bf16.vlgmr.msra.gmra.mxu1 %vm54_vm1, %v159_v4 }
 0x24f   :  { %v301_v18 = vpop.f32.mrf.mxu1  ;;  %v344_v19 = vpop.f32.mrf.mxu0 }
 0x250   :  { %v302_v20 = vadd.f32 %v301_v18, %v177_v14  ;;  %v345_v21 = vadd.f32 %v344_v19, %v185_v15 }
 0x251   :  { %v303_v23 = vpop.f32.mrf.mxu1  ;;  %v346_v24 = vpop.f32.mrf.mxu0 }
 0x252   :  { %396 = vst [vmem:[#allocation2] sm:$0xff] %v302_v20  ;;  %398 = vst [vmem:[#allocation2 + $0x10] sm:$0xff] %v345_v21  ;;  %v304_v25 = vadd.f32 %v303_v23, %v181_v16  ;;  %v347_v26 = vadd.f32 %v346_v24, %v189_v17 }
 0x253   :  { %v305_v28 = vpop.f32.mrf.mxu1  ;;  %v348_v29 = vpop.f32.mrf.mxu0 }
 0x254   :  { %397 = vst [vmem:[#allocation2 + $0x8] sm:$0xff] %v304_v25  ;;  %399 = vst [vmem:[#allocation2 + $0x18] sm:$0xff] %v347_v26  ;;  %v306_v30 = vadd.f32 %v305_v28, %v177_v14  ;;  %v349_v31 = vadd.f32 %v348_v29, %v185_v15 }
 0x255   :  { %v307_v33 = vpop.f32.mrf.mxu1  ;;  %v350_v34 = vpop.f32.mrf.mxu0 }
 0x256   :  { %402 = vst [vmem:[#allocation2 + $0x30] sm:$0xff] %v306_v30  ;;  %404 = vst [vmem:[#allocation2 + $0x40] sm:$0xff] %v349_v31  ;;  %v308_v35 = vadd.f32 %v307_v33, %v181_v16  ;;  %v351_v36 = vadd.f32 %v350_v34, %v189_v17 }
 0x257   :  { %v387_v38 = vpop.f32.mrf.mxu1 }
 0x258   :  { %403 = vst [vmem:[#allocation2 + $0x38] sm:$0xff] %v308_v35  ;;  %405 = vst [vmem:[#allocation2 + $0x48] sm:$0xff] %v351_v36  ;;  %v388_v39 = vadd.f32 %v387_v38, %v193_v32 }
 0x259   :  { %v389_v40 = vpop.f32.mrf.mxu1 }
 0x25a   :  { %400 = vst [vmem:[#allocation2 + $0x20] sm:$0xff] %v388_v39  ;;  %v390_v41 = vadd.f32 %v389_v40, %v197_v37 }
 0x25b   :  { %v391_v42 = vpop.f32.mrf.mxu1 }
 0x25c   :  { %401 = vst [vmem:[#allocation2 + $0x28] sm:$0xff] %v390_v41  ;;  %v392_v43 = vadd.f32 %v391_v42, %v193_v32 }
 0x25d   :  { %v393_v44 = vpop.f32.mrf.mxu1 }
 0x25e   :  { %406 = vst [vmem:[#allocation2 + $0x50] sm:$0xff] %v392_v43  ;;  %v394_v45 = vadd.f32 %v393_v44, %v197_v37 }
 0x260   :  { %407 = vst [vmem:[#allocation2 + $0x58] sm:$0xff] %v394_v45 }
 0x261   :  { %501 = shalt.err (!%p498_p4)
}
 0x262   :  { %s516_s11 = smov 768   ;;  %s517_s12 = smov 48  }
 0x263   :  { %419 = dma.vmem_to_hbm [thread:$0]  %s414_s6, 1536, %s636_s7, [#allocation3], %s516_s11, %s516_s11, %s517_s12  }
 0x264   :  { %510 = dma.done.wait [#allocation3], 1536  }
 0x265   :  { %511 = vsyncadd [#allocation3], 4294965760 }
 0x266   :  { %423 = vsyncpa [#allocation3], 1 }

</bundles_post_ra>
